<compile_context>
chip_gen: v7x
topology: tpu7x:2x2x1
jax: 0.10.0
libtpu: 0.0.40
codegen_flags: <defaults>
</compile_context>

<pallas_src>
import functools
import math

import numpy as np

import jax
import jax.numpy as jnp
from jax.experimental import pallas as pl
from jax.experimental.pallas import tpu as pltpu

_LANES = 128
_BLOCK_ROWS = 64          # fine-block height (multiple of 8 sublanes)
_MAX_FOLD_LANES = 1024    # cap on lane-folding width (8 vregs)
_TARGET_TILE_BYTES = 4 * 1024 * 1024
_MAX_BLOCKS_PER_TILE = 32  # bounds the static unroll / tile size


def _cdiv(a: int, b: int) -> int:
    return -(-a // b)


def _pe_kernel(fine_ref, coarse_ref, o_ref, *, blocks_per_tile: int):
    """Fill one (blocks_per_tile, BR, C) output tile.

    fine_ref   : (2, BR, C)  f32, tile-invariant:
                   fine1[j,c] = sin(A) if col even else  cos(A)
                   fine2[j,c] = cos(A) if col even else -sin(A)
                 with A = (j*per_row + q_c) * w_c  (fine angle within a block).
    coarse_ref : (blocks_per_tile, 2, C) f32: [cos(B_b), sin(B_b)] per block,
                 B_b = (global_block * BR * per_row) * w_c.
    o_ref      : (blocks_per_tile, BR, C) f32.

    out = fine1*cos(B) + fine2*sin(B)  ==  sin(p*w) / cos(p*w) per column parity.
    Exactly 2 mul + 1 add per element, zero transcendentals in-kernel.
    """
    fine1 = fine_ref[0]            # (BR, C)
    fine2 = fine_ref[1]            # (BR, C)
    for j in range(blocks_per_tile):        # static unroll (blocks_per_tile <= 32)
        cos_b = coarse_ref[j, 0:1, :]       # (1, C) -> sublane-broadcast
        sin_b = coarse_ref[j, 1:2, :]       # (1, C)
        o_ref[j] = fine1 * cos_b + fine2 * sin_b


@functools.lru_cache(maxsize=None)
def _pe_table(input_dim: int, max_len: int = 5000,
              target_tile_bytes: int = _TARGET_TILE_BYTES) -> jax.Array:
    """Build the full (1, max_len, input_dim) f32 table once; cached per shape."""
    # ---- lane-dense layout: n_cols lanes carry per_row consecutive positions ----
    if input_dim % _LANES == 0:
        n_cols, per_row = input_dim, 1
    else:
        lcm = input_dim * _LANES // math.gcd(input_dim, _LANES)
        if lcm <= _MAX_FOLD_LANES:
            n_cols, per_row = lcm, lcm // input_dim
        else:
            # TODO(synk): dims with lcm(input_dim, 128) > cap (e.g. 200) fall back
            # to the natural layout with masked stores.
            n_cols, per_row = input_dim, 1

    br = _BLOCK_ROWS
    rows = _cdiv(max_len, per_row)          # slab rows needed
    nb = _cdiv(rows, br)                    # 64-row blocks needed
    block_bytes = br * n_cols * 4
    bpt = max(1, min(target_tile_bytes // block_bytes,  # VMEM budget (x2 buffers)
                     _cdiv(nb, 4),                      # >=4 grid steps (v7x megacore)
                     _MAX_BLOCKS_PER_TILE,
                     nb))
    grid_steps = _cdiv(nb, bpt)
    nb_pad = grid_steps * bpt               # pad so every grid step is full

    # ---- host-side (float64-exact) parameter tables, tiny ----
    c = np.arange(n_cols)
    d = c % input_dim                                    # feature index per lane
    q = (c // input_dim).astype(np.float64)              # position offset within a row
    # f32-rounded frequencies (matches the module's f32 buffer), widened to f64
    # so the fine/coarse angle split is exact.
    w32 = np.exp(-(2.0 * (d // 2)) * (math.log(10000.0) / input_dim)).astype(np.float32)
    w = w32.astype(np.float64)
    even = (d % 2 == 0)

    j = np.arange(br, dtype=np.float64)[:, None]
    fine_angle = (j * per_row + q[None, :]) * w[None, :]          # (BR, C)
    s0, c0 = np.sin(fine_angle), np.cos(fine_angle)
    fine = np.stack([np.where(even, s0, c0),
                     np.where(even, c0, -s0)]).astype(np.float32)  # (2, BR, C)

    base = np.arange(nb_pad, dtype=np.float64)[:, None] * float(br * per_row)
    coarse_angle = base * w[None, :]                               # (nb_pad, C)
    coarse = np.stack([np.cos(coarse_angle), np.sin(coarse_angle)],
                      axis=1).astype(np.float32)                   # (nb_pad, 2, C)

    total = nb_pad * br * n_cols
    kernel = functools.partial(_pe_kernel, blocks_per_tile=bpt)

    slab = pl.pallas_call(
        kernel,
        out_shape=jax.ShapeDtypeStruct((nb_pad, br, n_cols), jnp.float32),
        grid_spec=pltpu.PrefetchScalarGridSpec(
            num_scalar_prefetch=0,
            grid=(grid_steps,),
            in_specs=[
                pl.BlockSpec((2, br, n_cols), lambda i: (0, 0, 0)),     # fine (resident)
                pl.BlockSpec((bpt, 2, n_cols), lambda i: (i, 0, 0)),    # coarse per tile
            ],
            out_specs=pl.BlockSpec((bpt, br, n_cols), lambda i: (i, 0, 0)),
        ),
        compiler_params=pltpu.CompilerParams(
            dimension_semantics=("parallel",),
        ),
        cost_estimate=pl.CostEstimate(
            flops=3 * total,
            transcendentals=0,
            bytes_accessed=4 * (total + fine.size + coarse.size),
        ),
    )(jnp.asarray(fine), jnp.asarray(coarse))

    # (nb_pad, BR, C) -> (nb_pad*BR*per_row, D): row-major merge/split, free.
    pe = slab.reshape(nb_pad * br * per_row, input_dim)[:max_len]
    return pe[None, :, :]                                          # (1, max_len, D)


def positional_encoding(x: jax.Array, max_len: int = 5000) -> jax.Array:
    """Equivalent of PositionalEncoding.forward: return pe[:, :x.shape[1]]."""
    _, seq_len, input_dim = x.shape
    if seq_len > max_len:
        raise ValueError("sequence length exceeds max_len")
    return _pe_table(input_dim, max_len)[:, :seq_len, :]


# ---------------------------------------------------------------------------
# References for self-test.
# ---------------------------------------------------------------------------
def _reference_f32(seq_len: int, input_dim: int) -> jnp.ndarray:
    """Pure-JAX f32 reference matching the PyTorch buffer construction."""
    position = jnp.arange(seq_len, dtype=jnp.float32)[:, None]
    div_term = jnp.exp(jnp.arange(0, input_dim, 2, dtype=jnp.float32)
                       * (-(math.log(10000.0) / input_dim)))
    pe = jnp.zeros((seq_len, input_dim), dtype=jnp.float32)
    pe = pe.at[:, 0::2].set(jnp.sin(position * div_term))
    pe = pe.at[:, 1::2].set(jnp.cos(position * div_term))
    return pe[None, :, :]


def _reference_f64(seq_len: int, input_dim: int) -> np.ndarray:
    """float64 reference (with f32-rounded frequencies) for large-position checks."""
    position = np.arange(seq_len, dtype=np.float64)[:, None]
    div_term = np.exp(np.arange(0, input_dim, 2, dtype=np.float64)
                      * (-(math.log(10000.0) / input_dim)))
    div_term = div_term.astype(np.float32).astype(np.float64)
    pe = np.zeros((seq_len, input_dim), dtype=np.float64)
    pe[:, 0::2] = np.sin(position * div_term)
    pe[:, 1::2] = np.cos(position * div_term)
    return pe[None, :, :]


if __name__ == "__main__":
    key = jax.random.PRNGKey(0)

    # Case 1: small feature dim (32) -> lane-folded (4 positions per 128-lane row).
    x1 = jax.random.normal(key, (2, 8, 32), dtype=jnp.float32)
    out1 = jax.block_until_ready(positional_encoding(x1))
    assert out1.shape == (1, 8, 32) and out1.dtype == jnp.float32
    assert jnp.allclose(out1, _reference_f32(8, 32), atol=1e-5, rtol=0)

    # Case 2: lane-aligned feature dim (128), multi-tile grid (4 steps).
    x2 = jax.random.normal(key, (1, 20, 128), dtype=jnp.float32)
    out2 = jax.block_until_ready(positional_encoding(x2))
    assert out2.shape == (1, 20, 128)
    assert jnp.allclose(out2, _reference_f32(20, 128), atol=1e-5, rtol=0)

    # Case 3: awkward feature dim (96) -> lcm folding: 384 lanes, 4 positions/row.
    x3 = jax.random.normal(key, (1, 16, 96), dtype=jnp.float32)
    out3 = jax.block_until_ready(positional_encoding(x3))
    assert out3.shape == (1, 16, 96)
    assert jnp.allclose(out3, _reference_f32(16, 96), atol=1e-5, rtol=0)

    # Large-position accuracy check (review concern): full cached table at
    # max_len=5000 vs a float64 reference.  (The f32 reference itself is only
    # accurate to ~2.4e-4 near position 5000 -- half an ulp of the angle -- so
    # float64 is the meaningful yardstick here; the kernel stays within a few
    # f32 ulps thanks to the f64-exact angle split.)
    table = np.asarray(jax.block_until_ready(_pe_table(128, 5000)))
    assert float(np.max(np.abs(table - _reference_f64(5000, 128)))) < 1e-4

    print("KERNEL_OK")
</pallas_src>

<mosaic_0001>
module attributes {stable_mosaic.version = 11 : i64} {
  func.func @_pe_kernel(%arg0: i32, %arg1: memref<2x64x128xf32, #tpu.memory_space<vmem>>, %arg2: memref<5x2x128xf32, #tpu.memory_space<vmem>>, %arg3: memref<5x64x128xf32, #tpu.memory_space<vmem>>) attributes {dimension_semantics = [#tpu.dimension_semantics<parallel>], iteration_bounds = array<i64: 4>, scalar_prefetch = 0 : i64, scratch_operands = 0 : i64, tpu.core_type = #tpu.core_type<tc>, window_params = [{pipeline_mode = #tpu.pipeline_mode<synchronous>, transform_indices = @transform_0, window_bounds = array<i64: 2, 64, 128>}, {transform_indices = @transform_1, window_bounds = array<i64: 5, 2, 128>}, {transform_indices = @transform_2, window_bounds = array<i64: 5, 64, 128>}]} {
    %c0 = arith.constant 0 : index
    %c0_0 = arith.constant 0 : index
    %c0_1 = arith.constant 0 : index
    %0 = vector.load %arg1[%c0, %c0_0, %c0_1] : memref<2x64x128xf32, #tpu.memory_space<vmem>>, vector<1x64x128xf32>
    %1 = vector.shape_cast %0 : vector<1x64x128xf32> to vector<64x128xf32>
    %c1 = arith.constant 1 : index
    %c0_2 = arith.constant 0 : index
    %c0_3 = arith.constant 0 : index
    %2 = vector.load %arg1[%c1, %c0_2, %c0_3] : memref<2x64x128xf32, #tpu.memory_space<vmem>>, vector<1x64x128xf32>
    %3 = vector.shape_cast %2 : vector<1x64x128xf32> to vector<64x128xf32>
    %c0_4 = arith.constant 0 : index
    %c0_5 = arith.constant 0 : index
    %c0_6 = arith.constant 0 : index
    %4 = vector.load %arg2[%c0_4, %c0_5, %c0_6] : memref<5x2x128xf32, #tpu.memory_space<vmem>>, vector<1x1x128xf32>
    %5 = vector.shape_cast %4 : vector<1x1x128xf32> to vector<1x128xf32>
    %c0_7 = arith.constant 0 : index
    %c1_8 = arith.constant 1 : index
    %c0_9 = arith.constant 0 : index
    %6 = vector.load %arg2[%c0_7, %c1_8, %c0_9] : memref<5x2x128xf32, #tpu.memory_space<vmem>>, vector<1x1x128xf32>
    %7 = vector.shape_cast %6 : vector<1x1x128xf32> to vector<1x128xf32>
    %8 = vector.broadcast %5 : vector<1x128xf32> to vector<64x128xf32>
    %9 = arith.mulf %1, %8 : vector<64x128xf32>
    %10 = vector.broadcast %7 : vector<1x128xf32> to vector<64x128xf32>
    %11 = arith.mulf %3, %10 : vector<64x128xf32>
    %12 = arith.addf %9, %11 : vector<64x128xf32>
    %c0_10 = arith.constant 0 : index
    %c0_11 = arith.constant 0 : index
    %c0_12 = arith.constant 0 : index
    %13 = vector.load %arg3[%c0_10, %c0_11, %c0_12] : memref<5x64x128xf32, #tpu.memory_space<vmem>>, vector<1x64x128xf32>
    %14 = vector.shape_cast %13 : vector<1x64x128xf32> to vector<64x128xf32>
    %15 = vector.shape_cast %12 : vector<64x128xf32> to vector<1x64x128xf32>
    tpu.vector_store %arg3[%c0_10, %c0_11, %c0_12], %15 {strides = array<i32>} : memref<5x64x128xf32, #tpu.memory_space<vmem>>, vector<1x64x128xf32>,
    %c1_13 = arith.constant 1 : index
    %c0_14 = arith.constant 0 : index
    %c0_15 = arith.constant 0 : index
    %16 = vector.load %arg2[%c1_13, %c0_14, %c0_15] : memref<5x2x128xf32, #tpu.memory_space<vmem>>, vector<1x1x128xf32>
    %17 = vector.shape_cast %16 : vector<1x1x128xf32> to vector<1x128xf32>
    %c1_16 = arith.constant 1 : index
    %c1_17 = arith.constant 1 : index
    %c0_18 = arith.constant 0 : index
    %18 = vector.load %arg2[%c1_16, %c1_17, %c0_18] : memref<5x2x128xf32, #tpu.memory_space<vmem>>, vector<1x1x128xf32>
    %19 = vector.shape_cast %18 : vector<1x1x128xf32> to vector<1x128xf32>
    %20 = vector.broadcast %17 : vector<1x128xf32> to vector<64x128xf32>
    %21 = arith.mulf %1, %20 : vector<64x128xf32>
    %22 = vector.broadcast %19 : vector<1x128xf32> to vector<64x128xf32>
    %23 = arith.mulf %3, %22 : vector<64x128xf32>
    %24 = arith.addf %21, %23 : vector<64x128xf32>
    %c1_19 = arith.constant 1 : index
    %c0_20 = arith.constant 0 : index
    %c0_21 = arith.constant 0 : index
    %25 = vector.load %arg3[%c1_19, %c0_20, %c0_21] : memref<5x64x128xf32, #tpu.memory_space<vmem>>, vector<1x64x128xf32>
    %26 = vector.shape_cast %25 : vector<1x64x128xf32> to vector<64x128xf32>
    %27 = vector.shape_cast %24 : vector<64x128xf32> to vector<1x64x128xf32>
    tpu.vector_store %arg3[%c1_19, %c0_20, %c0_21], %27 {strides = array<i32>} : memref<5x64x128xf32, #tpu.memory_space<vmem>>, vector<1x64x128xf32>,
    %c2 = arith.constant 2 : index
    %c0_22 = arith.constant 0 : index
    %c0_23 = arith.constant 0 : index
    %28 = vector.load %arg2[%c2, %c0_22, %c0_23] : memref<5x2x128xf32, #tpu.memory_space<vmem>>, vector<1x1x128xf32>
    %29 = vector.shape_cast %28 : vector<1x1x128xf32> to vector<1x128xf32>
    %c2_24 = arith.constant 2 : index
    %c1_25 = arith.constant 1 : index
    %c0_26 = arith.constant 0 : index
    %30 = vector.load %arg2[%c2_24, %c1_25, %c0_26] : memref<5x2x128xf32, #tpu.memory_space<vmem>>, vector<1x1x128xf32>
    %31 = vector.shape_cast %30 : vector<1x1x128xf32> to vector<1x128xf32>
    %32 = vector.broadcast %29 : vector<1x128xf32> to vector<64x128xf32>
    %33 = arith.mulf %1, %32 : vector<64x128xf32>
    %34 = vector.broadcast %31 : vector<1x128xf32> to vector<64x128xf32>
    %35 = arith.mulf %3, %34 : vector<64x128xf32>
    %36 = arith.addf %33, %35 : vector<64x128xf32>
    %c2_27 = arith.constant 2 : index
    %c0_28 = arith.constant 0 : index
    %c0_29 = arith.constant 0 : index
    %37 = vector.load %arg3[%c2_27, %c0_28, %c0_29] : memref<5x64x128xf32, #tpu.memory_space<vmem>>, vector<1x64x128xf32>
    %38 = vector.shape_cast %37 : vector<1x64x128xf32> to vector<64x128xf32>
    %39 = vector.shape_cast %36 : vector<64x128xf32> to vector<1x64x128xf32>
    tpu.vector_store %arg3[%c2_27, %c0_28, %c0_29], %39 {strides = array<i32>} : memref<5x64x128xf32, #tpu.memory_space<vmem>>, vector<1x64x128xf32>,
    %c3 = arith.constant 3 : index
    %c0_30 = arith.constant 0 : index
    %c0_31 = arith.constant 0 : index
    %40 = vector.load %arg2[%c3, %c0_30, %c0_31] : memref<5x2x128xf32, #tpu.memory_space<vmem>>, vector<1x1x128xf32>
    %41 = vector.shape_cast %40 : vector<1x1x128xf32> to vector<1x128xf32>
    %c3_32 = arith.constant 3 : index
    %c1_33 = arith.constant 1 : index
    %c0_34 = arith.constant 0 : index
    %42 = vector.load %arg2[%c3_32, %c1_33, %c0_34] : memref<5x2x128xf32, #tpu.memory_space<vmem>>, vector<1x1x128xf32>
    %43 = vector.shape_cast %42 : vector<1x1x128xf32> to vector<1x128xf32>
    %44 = vector.broadcast %41 : vector<1x128xf32> to vector<64x128xf32>
    %45 = arith.mulf %1, %44 : vector<64x128xf32>
    %46 = vector.broadcast %43 : vector<1x128xf32> to vector<64x128xf32>
    %47 = arith.mulf %3, %46 : vector<64x128xf32>
    %48 = arith.addf %45, %47 : vector<64x128xf32>
    %c3_35 = arith.constant 3 : index
    %c0_36 = arith.constant 0 : index
    %c0_37 = arith.constant 0 : index
    %49 = vector.load %arg3[%c3_35, %c0_36, %c0_37] : memref<5x64x128xf32, #tpu.memory_space<vmem>>, vector<1x64x128xf32>
    %50 = vector.shape_cast %49 : vector<1x64x128xf32> to vector<64x128xf32>
    %51 = vector.shape_cast %48 : vector<64x128xf32> to vector<1x64x128xf32>
    tpu.vector_store %arg3[%c3_35, %c0_36, %c0_37], %51 {strides = array<i32>} : memref<5x64x128xf32, #tpu.memory_space<vmem>>, vector<1x64x128xf32>,
    %c4 = arith.constant 4 : index
    %c0_38 = arith.constant 0 : index
    %c0_39 = arith.constant 0 : index
    %52 = vector.load %arg2[%c4, %c0_38, %c0_39] : memref<5x2x128xf32, #tpu.memory_space<vmem>>, vector<1x1x128xf32>
    %53 = vector.shape_cast %52 : vector<1x1x128xf32> to vector<1x128xf32>
    %c4_40 = arith.constant 4 : index
    %c1_41 = arith.constant 1 : index
    %c0_42 = arith.constant 0 : index
    %54 = vector.load %arg2[%c4_40, %c1_41, %c0_42] : memref<5x2x128xf32, #tpu.memory_space<vmem>>, vector<1x1x128xf32>
    %55 = vector.shape_cast %54 : vector<1x1x128xf32> to vector<1x128xf32>
    %56 = vector.broadcast %53 : vector<1x128xf32> to vector<64x128xf32>
    %57 = arith.mulf %1, %56 : vector<64x128xf32>
    %58 = vector.broadcast %55 : vector<1x128xf32> to vector<64x128xf32>
    %59 = arith.mulf %3, %58 : vector<64x128xf32>
    %60 = arith.addf %57, %59 : vector<64x128xf32>
    %c4_43 = arith.constant 4 : index
    %c0_44 = arith.constant 0 : index
    %c0_45 = arith.constant 0 : index
    %61 = vector.load %arg3[%c4_43, %c0_44, %c0_45] : memref<5x64x128xf32, #tpu.memory_space<vmem>>, vector<1x64x128xf32>
    %62 = vector.shape_cast %61 : vector<1x64x128xf32> to vector<64x128xf32>
    %63 = vector.shape_cast %60 : vector<64x128xf32> to vector<1x64x128xf32>
    tpu.vector_store %arg3[%c4_43, %c0_44, %c0_45], %63 {strides = array<i32>} : memref<5x64x128xf32, #tpu.memory_space<vmem>>, vector<1x64x128xf32>,
    return
  }
  func.func @transform_0(%arg0: i32) -> (i32, i32, i32) {
    %c0_i32 = arith.constant 0 : i32
    %c0_i32_0 = arith.constant 0 : i32
    %c0_i32_1 = arith.constant 0 : i32
    %c0_i32_2 = arith.constant 0 : i32
    return %c0_i32, %c0_i32_0, %c0_i32_1 : i32, i32, i32
  }
  func.func @transform_1(%arg0: i32) -> (i32, i32, i32) {
    %c0_i32 = arith.constant 0 : i32
    %c0_i32_0 = arith.constant 0 : i32
    %c0_i32_1 = arith.constant 0 : i32
    return %arg0, %c0_i32, %c0_i32_0 : i32, i32, i32
  }
  func.func @transform_2(%arg0: i32) -> (i32, i32, i32) {
    %c0_i32 = arith.constant 0 : i32
    %c0_i32_0 = arith.constant 0 : i32
    %c0_i32_1 = arith.constant 0 : i32
    return %arg0, %c0_i32, %c0_i32_0 : i32, i32, i32
  }
}

</mosaic_0001>

<bundles_post_ra>
// kernel: tpu_custom_call.1
= control target key start
LH: loop header
LB: loop body
LE: loop exit
PB: predicated region body
PF: predicated region fallthrough
CT: control target
= control target key end

     0   :  { %7 = vsyncpa [#allocation3], 0  ;;  %s1161_s0 = inlined_call_operand.hbm [shape: f32[2,64,128], index: 0, kind: input, shape index: {}]   ;;  %s1162_s1 = inlined_call_operand.hbm [shape: f32[20,2,128], index: 1, kind: input, shape index: {}]   ;;  %s1163_s2 = inlined_call_operand.hbm [shape: f32[20,64,128], index: 2, kind: output, shape index: {}]  }
   0x1   :  { %8 = vsyncpa [#allocation6], 0 }
   0x2   :  { %10 = vsyncpa [#allocation6 + $0x1], 0 }
   0x3   :  { %11 = vsyncpa [#allocation4], 0 }
   0x4   :  { %13 = vsyncpa [#allocation4 + $0x1], 0  ;;  %s799_s9 = smov 0   ;;  %s801_s10 = smov 0  }
   0x5   :  { %s803_s11 = smov 0   ;;  %s805_s12 = smov 0  }
   0x6 LB: > { %s820_s13 = sadd.s32 4294967295, %s773_s12   ;;  %s514_s14 = sadd.s32 4294967294, %s773_s12   ;;  %s773_s12 = sphi %s805_s12, %s1182_s12   ;;  %s769_s11 = sphi %s803_s11, %s1181_s11   ;;  %s765_s10 = sphi %s801_s10, %s1180_s10   ;;  %s761_s9 = sphi %s799_s9, %s1179_s9  }
   0x7   : > { %p60_p0 = scmp.ne.s32.totalorder %s765_s10, %s761_s9  ;;  %p1164_p1 = scmp.eq.s32.totalorder %s820_s13, 0 }
   0x8   : > { %p90_p3 = scmp.eq.s32.totalorder %s514_s14, 3  ;;  %p515_p5 = scmp.ge.s32.totalorder %s773_s12, 1 }
   0x9   : > { %p829_p4 = por %p1164_p1, %p60_p0  ;;  %p97_p7 = scmp.lt.s32.totalorder %s773_s12, 5 }
   0xa   : > { %p834_p6 = por %p90_p3, %p60_p0  ;;  %s775_s18 = smov [#allocation2]  }
   0xb   : > { %s1167_s15 = scalar_select %p829_p4, 1, 0 }
   0xc   : > { %s1168_s16 = scalar_select %p834_p6, 1, 0 }
   0xd   : > { %p839_p8 = pnand %p515_p5, %p97_p7  ;;  %s109_s19 = sshll.u32 %s775_s18, 4  ;;  %s110_s19 = int_to_ptr.vmem [resolvable:$true] %s109_s19 }
   0xe   : > { %s852_s21 = sadd.s32 1, %s773_s12   ;;  %s47_s22 = sadd.s32 1, %s769_s11 }
   0xf   : > { %s1169_s17 = scalar_select %p839_p8, 1, 0 }
  0x10   : > { %p590_p9 = pneg %p839_p8  ;;  %s44_s23 = ssub.s32 %s773_s12, %s852_s21 }
  0x11   : > { %s645_s26 = scalar_lea.hbm %s1161_s0, 2048 }
  0x12   : > { %p847_p10 = pnand %p590_p9, %p1164_p1  ;;  %p646_p11 = scmp.ne.s32.totalorder %s1161_s0, %s645_s26 }
  0x13   : > { %p652_p3 = scmp.lt.u32.totalorder %s645_s26, %s1161_s0 }
  0x14   : > { %p647_p12 = pneg %p847_p10 }
  0x16   : > { %p648_p13 = pnand %p647_p12, %p646_p11 }
  0x18   : > { %p649_p0 = pneg %p648_p13 }
  0x1a   : > { %p654_p5 = pnand %p652_p3, %p649_p0 }
  0x1c   : > { %657 = shalt.err (!%p654_p5)
}
  0x1d   : > { %s658_s3 = scalar_lea.vmem %s110_s19, 2048  ;;  %p666_p2 = scmp.lt.s32.totalorder %s110_s19, %s110_s19 }
  0x1e   : > { %p659_p7 = scmp.ne.s32.totalorder %s110_s19, %s658_s3  ;;  %p667_p6 = scmp.lt.s32.totalorder %s658_s3, %s658_s3 }
  0x20   : > { %p661_p9 = pnand %p659_p7, %p647_p12  ;;  %p668_p4 = por %p667_p6, %p666_p2 }
  0x22   : > { %p662_p1 = pneg %p661_p9 }
  0x24   : > { %p669_p8 = pnand %p668_p4, %p662_p1 }
  0x26   : > { %672 = shalt.err (!%p669_p8)
}
  0x27   : > { %s776_s4 = smov 128   ;;  %s777_s5 = smov 8  }
  0x28   : > { %593 = dma.hbm_to_vmem [thread:$0]  (!%p847_p10), %s1161_s0, 2048, %s110_s19, [#allocation3], %s776_s4, %s776_s4, %s777_s5  }
  0x29   : > { %p45_p11 = scmp.eq.s32.totalorder %s44_s23, 0  ;;  %p54_p2 = scmp.ne.s32.totalorder %s769_s11, %s765_s10 }
  0x2a   : > { %p55_p1 = scmp.eq.s32.totalorder %s773_s12, 0  ;;  %p603_p4 = scmp.lt.s32.totalorder %s773_s12, 4 }
  0x2b   : > { %s878_s8 = scalar_select %p45_p11, %s769_s11, %s47_s22  }
  0x2c   : > { %p56_p6 = por %p55_p1, %p54_p2  ;;  %p1171_p8 = scmp.eq.s32.totalorder %s820_s13, 3 }
  0x2d   : > { %s123_s18 = sand.u32 1, %s769_s11   ;;  %s575_s24 = smul.u32 160, %s773_s12 }
  0x2e   : > { %p882_p12 = por %p1171_p8, %p54_p2  ;;  %s579_s25 = smul.u32 10, %s123_s18 }
  0x2f   : > { %s891_s27 = scalar_lea.hbm %s1162_s1, %s575_s24  ;;  %p893_p10 = pnand %p603_p4, %p56_p6 }
  0x30   : > { %s127_s22 = scalar_lea.vmem [#allocation5], %s579_s25  ;;  %s899_s28 = scalar_lea.sflag [#allocation6], %s123_s18 }
  0x31   : > { %s134_s23 = sshll.u32 %s127_s22, 4  ;;  %s673_s29 = scalar_lea.hbm %s891_s27, 160  ;;  %s897_s23 = int_to_ptr.vmem [resolvable:$true] %s134_s23 }
  0x32   : > { %p674_p13 = scmp.ne.s32.totalorder %s891_s27, %s673_s29  ;;  %p675_p0 = pneg %p893_p10 }
  0x33   : > { %s678_s4 = scalar_lea.hbm %s1162_s1, 640  ;;  %p679_p7 = scmp.lt.u32.totalorder %s891_s27, %s1162_s1 }
  0x34   : > { %p676_p3 = pnand %p675_p0, %p674_p13  ;;  %p680_p9 = scmp.lt.u32.totalorder %s678_s4, %s673_s29 }
  0x35   : > { %p682_p2 = scmp.lt.u32.totalorder %s673_s29, %s891_s27 }
  0x36   : > { %p677_p5 = pneg %p676_p3  ;;  %p681_p11 = por %p680_p9, %p679_p7 }
  0x38   : > { %p683_p1 = por %p682_p2, %p681_p11 }
  0x3a   : > { %p684_p4 = pnand %p683_p1, %p677_p5 }
  0x3c   : > { %687 = shalt.err (!%p684_p4)
}
  0x3d   : > { %s688_s7 = scalar_lea.vmem %s897_s23, 160  ;;  %s778_s18 = smov [#allocation5]  }
  0x3e   : > { %p689_p6 = scmp.ne.s32.totalorder %s897_s23, %s688_s7  ;;  %s693_s24 = sshll.u32 %s778_s18, 4  ;;  %s694_s24 = int_to_ptr.vmem [resolvable:$false] %s693_s24 }
  0x3f   : > { %s695_s25 = scalar_lea.vmem %s694_s24, 320  ;;  %p696_p3 = scmp.lt.s32.totalorder %s897_s23, %s694_s24 }
  0x40   : > { %p691_p8 = pnand %p689_p6, %p675_p0  ;;  %p697_p7 = scmp.lt.s32.totalorder %s695_s25, %s688_s7 }
  0x42   : > { %p692_p13 = pneg %p691_p8  ;;  %p698_p9 = por %p697_p7, %p696_p3 }
  0x44   : > { %p699_p11 = pnand %p698_p9, %p692_p13 }
  0x46   : > { %702 = shalt.err (!%p699_p11)
}
  0x47   : > { %s779_s20 = smov 32   ;;  %s780_s26 = smov 2  }
  0x48   : > { %597 = dma.hbm_to_vmem [thread:$0]  (!%p893_p10), %s891_s27, 160, %s897_s23, %s899_s28, %s779_s20, %s779_s20, %s780_s26  }
  0x49   : > { %p1174_p0 = scmp.ne.s32.totalorder %s1169_s17, 0 }
  0x4a   : > { %p1175_p5 = scmp.eq.s32.totalorder (!%p1174_p0), %s820_s13, 0 }
  0x4b   : > { %146 = sbr.rel (%p1174_p0) target bundleno = 140 (0x8c), region = 28 }
  0x52   : > { %748 = dma.done.wait (%p1175_p5), [#allocation3], 2048   ;;  %p1176_p2 = pmov %p1175_p5 }
  0x53   : > { %s934_s22 = sand.u32 1, %s765_s10   ;;  %p1177_p10 = scmp.ne.s32.totalorder %s1167_s15, 0 }
  0x54   : > { %750 = vsyncadd (%p1176_p2), [#allocation3], 4294965248  ;;  %s580_s29 = smul.u32 10, %s934_s22  ;;  %s153_s30 = scalar_lea.sflag [#allocation6], %s934_s22 }
  0x56   : > { %s938_s3 = scalar_lea.vmem [#allocation5], %s580_s29 }
  0x57   : > { %752 = dma.done.wait (%p1177_p10), %s153_s30, 160  }
  0x58   : > { %754 = vsyncadd (%p1177_p10), %s153_s30, 4294967136  ;;  %s581_s17 = smul.u32 320, %s934_s22  ;;  %v945_v0 = vld [vmem:[#allocation2] sm:$0xff]  ;;  %v952_v5 = vld [vmem:[#allocation2 + $0x8] sm:$0xff]  ;;  %s415_s4 = scalar_lea.sflag [#allocation4], %s934_s22 }
  0x59   : > { %v947_v1 = vld [vmem:[#allocation2 + $0x40] sm:$0xff]  ;;  %v954_v6 = vld [vmem:[#allocation2 + $0x48] sm:$0xff]  ;;  %v959_v10 = vld [vmem:[#allocation2 + $0x10] sm:$0xff]  ;;  %s578_s27 = smul.u32 5120, %s820_s13  ;;  %s781_s6 = smov [#allocation7]  }
  0x5a   : > { %v521_v2 = vld [vmem:[%s938_s3] ss:$0 sm:$0xff]  ;;  %v522_v3 = vld [vmem:[%s938_s3 + $0x1] ss:$0 sm:$0xff]  ;;  %v961_v11 = vld [vmem:[#allocation2 + $0x50] sm:$0xff]  ;;  %s993_s15 = scalar_lea.vmem [#allocation7], %s581_s17 }
  0x5b   : > { %v202_v4 = vmul.f32 %v521_v2, %v945_v0  ;;  %v214_v7 = vmul.f32 %v522_v3, %v947_v1  ;;  %v203_v8 = vmul.f32 %v521_v2, %v952_v5  ;;  %v215_v9 = vmul.f32 %v522_v3, %v954_v6  ;;  %v963_v12 = vld [vmem:[#allocation2 + $0x18] sm:$0xff]  ;;  %v970_v17 = vld [vmem:[#allocation2 + $0x20] sm:$0xff]  ;;  %v976_v23 = vld [vmem:[#allocation2 + $0x28] sm:$0xff]  ;;  %s429_s19 = sshll.u32 %s993_s15, 4  ;;  %s1114_s28 = scalar_lea.hbm %s1163_s2, %s578_s27  ;;  %s1116_s19 = int_to_ptr.vmem [resolvable:$true] %s429_s19 }
  0x5c   : > { %v204_v13 = vmul.f32 %v521_v2, %v959_v10  ;;  %v216_v14 = vmul.f32 %v522_v3, %v961_v11  ;;  %v967_v15 = vld [vmem:[#allocation2 + $0x58] sm:$0xff]  ;;  %v205_v16 = vmul.f32 %v521_v2, %v963_v12  ;;  %v972_v18 = vld [vmem:[#allocation2 + $0x60] sm:$0xff]  ;;  %v206_v22 = vmul.f32 %v521_v2, %v970_v17  ;;  %v978_v24 = vld [vmem:[#allocation2 + $0x68] sm:$0xff]  ;;  %s703_s5 = scalar_lea.vmem %s1116_s19, 5120  ;;  %s707_s7 = sshll.u32 %s781_s6, 4  ;;  %s708_s7 = int_to_ptr.vmem [resolvable:$false] %s707_s7 }
  0x5d   : > { %v222_v19 = vadd.f32 %v214_v7, %v202_v4  ;;  %v223_v20 = vadd.f32 %v215_v9, %v203_v8  ;;  %v217_v21 = vmul.f32 %v522_v3, %v967_v15  ;;  %v980_v25 = vld [vmem:[#allocation2 + $0x30] sm:$0xff]  ;;  %v218_v27 = vmul.f32 %v522_v3, %v972_v18  ;;  %v987_v31 = vld [vmem:[#allocation2 + $0x38] sm:$0xff]  ;;  %v525_v37 = vld [vmem:[%s938_s3 + $0x2] ss:$0 sm:$0xff]  ;;  %p704_p1 = scmp.ne.s32.totalorder %s1116_s19, %s703_s5  ;;  %s709_s18 = scalar_lea.vmem %s708_s7, 10240 }
  0x5e   : > { %v224_v26 = vadd.f32 %v216_v14, %v204_v13  ;;  %v207_v28 = vmul.f32 %v521_v2, %v976_v23  ;;  %v219_v29 = vmul.f32 %v522_v3, %v978_v24  ;;  %v985_v30 = vld [vmem:[#allocation2 + $0x70] sm:$0xff]  ;;  %v989_v32 = vld [vmem:[#allocation2 + $0x78] sm:$0xff]  ;;  %v208_v34 = vmul.f32 %v521_v2, %v980_v25  ;;  %v526_v38 = vld [vmem:[%s938_s3 + $0x3] ss:$0 sm:$0xff]  ;;  %p710_p8 = scmp.lt.s32.totalorder %s1116_s19, %s708_s7  ;;  %p711_p13 = scmp.lt.s32.totalorder %s709_s18, %s703_s5 }
  0x5f   : > { %230 = vst [vmem:[%s993_s15] sm:$0xff] %v222_v19  ;;  %231 = vst [vmem:[%s993_s15 + $0x8] sm:$0xff] %v223_v20  ;;  %v225_v33 = vadd.f32 %v217_v21, %v205_v16  ;;  %v220_v35 = vmul.f32 %v522_v3, %v985_v30  ;;  %v209_v36 = vmul.f32 %v521_v2, %v987_v31  ;;  %v537_v55 = vld [vmem:[%s938_s3 + $0x4] ss:$0 sm:$0xff]  ;;  %v538_v60 = vld [vmem:[%s938_s3 + $0x5] ss:$0 sm:$0xff]  ;;  %p705_p4 = pnand %p704_p1, %p882_p12 }
  0x60   : > { %232 = vst [vmem:[%s993_s15 + $0x10] sm:$0xff] %v224_v26  ;;  %v226_v39 = vadd.f32 %v218_v27, %v206_v22  ;;  %v227_v40 = vadd.f32 %v219_v29, %v207_v28  ;;  %v221_v41 = vmul.f32 %v522_v3, %v989_v32  ;;  %v245_v42 = vmul.f32 %v525_v37, %v945_v0  ;;  %p712_p3 = por %p711_p13, %p710_p8 }
  0x61   : > { %233 = vst [vmem:[%s993_s15 + $0x18] sm:$0xff] %v225_v33  ;;  %v228_v43 = vadd.f32 %v220_v35, %v208_v34  ;;  %v257_v44 = vmul.f32 %v526_v38, %v947_v1  ;;  %v246_v45 = vmul.f32 %v525_v37, %v952_v5  ;;  %v258_v46 = vmul.f32 %v526_v38, %v954_v6  ;;  %v549_v33 = vld [vmem:[%s938_s3 + $0x6] ss:$0 sm:$0xff]  ;;  %p706_p6 = pneg %p705_p4 }
  0x62   : > { %234 = vst [vmem:[%s993_s15 + $0x20] sm:$0xff] %v226_v39  ;;  %235 = vst [vmem:[%s993_s15 + $0x28] sm:$0xff] %v227_v40  ;;  %v229_v47 = vadd.f32 %v221_v41, %v209_v36  ;;  %v247_v48 = vmul.f32 %v525_v37, %v959_v10  ;;  %v259_v49 = vmul.f32 %v526_v38, %v961_v11 }
  0x63   : > { %v248_v50 = vmul.f32 %v525_v37, %v963_v12  ;;  %236 = vst [vmem:[%s993_s15 + $0x30] sm:$0xff] %v228_v43  ;;  %v265_v51 = vadd.f32 %v257_v44, %v245_v42  ;;  %v266_v52 = vadd.f32 %v258_v46, %v246_v45  ;;  %v260_v53 = vmul.f32 %v526_v38, %v967_v15  ;;  %p713_p7 = pnand %p712_p3, %p706_p6 }
  0x64   : > { %v249_v54 = vmul.f32 %v525_v37, %v970_v17  ;;  %237 = vst [vmem:[%s993_s15 + $0x38] sm:$0xff] %v229_v47  ;;  %v267_v56 = vadd.f32 %v259_v49, %v247_v48  ;;  %v261_v57 = vmul.f32 %v526_v38, %v972_v18  ;;  %v250_v58 = vmul.f32 %v525_v37, %v976_v23 }
  0x65   : > { %v262_v59 = vmul.f32 %v526_v38, %v978_v24  ;;  %527 = vst [vmem:[%s993_s15 + $0x40] sm:$0xff] %v265_v51  ;;  %528 = vst [vmem:[%s993_s15 + $0x48] sm:$0xff] %v266_v52  ;;  %v268_v61 = vadd.f32 %v260_v53, %v248_v50  ;;  %v251_v62 = vmul.f32 %v525_v37, %v980_v25 }
  0x66   : > { %v263_v63 = vmul.f32 %v526_v38, %v985_v30  ;;  %v252_v2 = vmul.f32 %v525_v37, %v987_v31  ;;  %529 = vst [vmem:[%s993_s15 + $0x50] sm:$0xff] %v267_v56  ;;  %v269_v3 = vadd.f32 %v261_v57, %v249_v54  ;;  %v264_v7 = vmul.f32 %v526_v38, %v989_v32  ;;  %v550_v38 = vld [vmem:[%s938_s3 + $0x7] ss:$0 sm:$0xff] }
  0x67   : > { %v270_v4 = vadd.f32 %v262_v59, %v250_v58  ;;  %v289_v8 = vmul.f32 %v537_v55, %v945_v0  ;;  %530 = vst [vmem:[%s993_s15 + $0x58] sm:$0xff] %v268_v61  ;;  %v301_v13 = vmul.f32 %v538_v60, %v947_v1  ;;  %v290_v14 = vmul.f32 %v537_v55, %v952_v5  ;;  %v561_v59 = vld [vmem:[%s938_s3 + $0x8] ss:$0 sm:$0xff] }
  0x68   : > { %v271_v9 = vadd.f32 %v263_v63, %v251_v62  ;;  %v302_v16 = vmul.f32 %v538_v60, %v954_v6  ;;  %531 = vst [vmem:[%s993_s15 + $0x60] sm:$0xff] %v269_v3  ;;  %v272_v19 = vadd.f32 %v264_v7, %v252_v2  ;;  %v291_v20 = vmul.f32 %v537_v55, %v959_v10  ;;  %v562_v2 = vld [vmem:[%s938_s3 + $0x9] ss:$0 sm:$0xff] }
  0x69   : > { %532 = vst [vmem:[%s993_s15 + $0x68] sm:$0xff] %v270_v4  ;;  %v303_v21 = vmul.f32 %v538_v60, %v961_v11  ;;  %v292_v22 = vmul.f32 %v537_v55, %v963_v12  ;;  %v309_v26 = vadd.f32 %v301_v13, %v289_v8  ;;  %v304_v28 = vmul.f32 %v538_v60, %v967_v15 }
  0x6a   : > { %533 = vst [vmem:[%s993_s15 + $0x70] sm:$0xff] %v271_v9  ;;  %v310_v27 = vadd.f32 %v302_v16, %v290_v14  ;;  %v293_v29 = vmul.f32 %v537_v55, %v970_v17  ;;  %534 = vst [vmem:[%s993_s15 + $0x78] sm:$0xff] %v272_v19  ;;  %v305_v35 = vmul.f32 %v538_v60, %v972_v18 }
  0x6b   : > { %v311_v34 = vadd.f32 %v303_v21, %v291_v20  ;;  %v294_v36 = vmul.f32 %v537_v55, %v976_v23  ;;  %v306_v37 = vmul.f32 %v538_v60, %v978_v24  ;;  %539 = vst [vmem:[%s993_s15 + $0x80] sm:$0xff] %v309_v26  ;;  %v312_v39 = vadd.f32 %v304_v28, %v292_v22 }
  0x6c   : > { %540 = vst [vmem:[%s993_s15 + $0x88] sm:$0xff] %v310_v27  ;;  %v295_v40 = vmul.f32 %v537_v55, %v980_v25  ;;  %v307_v41 = vmul.f32 %v538_v60, %v985_v30  ;;  %v296_v42 = vmul.f32 %v537_v55, %v987_v31  ;;  %v313_v43 = vadd.f32 %v305_v35, %v293_v29 }
  0x6d   : > { %541 = vst [vmem:[%s993_s15 + $0x90] sm:$0xff] %v311_v34  ;;  %v314_v44 = vadd.f32 %v306_v37, %v294_v36  ;;  %v308_v45 = vmul.f32 %v538_v60, %v989_v32  ;;  %v333_v46 = vmul.f32 %v549_v33, %v945_v0  ;;  %542 = vst [vmem:[%s993_s15 + $0x98] sm:$0xff] %v312_v39 }
  0x6e   : > { %v315_v47 = vadd.f32 %v307_v41, %v295_v40  ;;  %v345_v48 = vmul.f32 %v550_v38, %v947_v1  ;;  %v334_v49 = vmul.f32 %v549_v33, %v952_v5  ;;  %v346_v50 = vmul.f32 %v550_v38, %v954_v6  ;;  %543 = vst [vmem:[%s993_s15 + $0xa0] sm:$0xff] %v313_v43 }
  0x6f   : > { %544 = vst [vmem:[%s993_s15 + $0xa8] sm:$0xff] %v314_v44  ;;  %v316_v51 = vadd.f32 %v308_v45, %v296_v42  ;;  %v335_v52 = vmul.f32 %v549_v33, %v959_v10  ;;  %v347_v53 = vmul.f32 %v550_v38, %v961_v11  ;;  %v336_v54 = vmul.f32 %v549_v33, %v963_v12 }
  0x70   : > { %545 = vst [vmem:[%s993_s15 + $0xb0] sm:$0xff] %v315_v47  ;;  %v353_v55 = vadd.f32 %v345_v48, %v333_v46  ;;  %v354_v56 = vadd.f32 %v346_v50, %v334_v49  ;;  %v348_v57 = vmul.f32 %v550_v38, %v967_v15  ;;  %v337_v58 = vmul.f32 %v549_v33, %v970_v17 }
  0x71   : > { %546 = vst [vmem:[%s993_s15 + $0xb8] sm:$0xff] %v316_v51  ;;  %v355_v60 = vadd.f32 %v347_v53, %v335_v52  ;;  %v349_v61 = vmul.f32 %v550_v38, %v972_v18  ;;  %v338_v62 = vmul.f32 %v549_v33, %v976_v23  ;;  %v350_v63 = vmul.f32 %v550_v38, %v978_v24 }
  0x72   : > { %551 = vst [vmem:[%s993_s15 + $0xc0] sm:$0xff] %v353_v55  ;;  %552 = vst [vmem:[%s993_s15 + $0xc8] sm:$0xff] %v354_v56  ;;  %v356_v3 = vadd.f32 %v348_v57, %v336_v54  ;;  %v339_v4 = vmul.f32 %v549_v33, %v980_v25  ;;  %v351_v7 = vmul.f32 %v550_v38, %v985_v30 }
  0x73   : > { %v340_v8 = vmul.f32 %v549_v33, %v987_v31  ;;  %553 = vst [vmem:[%s993_s15 + $0xd0] sm:$0xff] %v355_v60  ;;  %v357_v9 = vadd.f32 %v349_v61, %v337_v58  ;;  %v358_v13 = vadd.f32 %v350_v63, %v338_v62  ;;  %v352_v14 = vmul.f32 %v550_v38, %v989_v32 }
  0x74   : > { %v377_v16 = vmul.f32 %v561_v59, %v945_v0  ;;  %554 = vst [vmem:[%s993_s15 + $0xd8] sm:$0xff] %v356_v3  ;;  %v359_v19 = vadd.f32 %v351_v7, %v339_v4  ;;  %v389_v20 = vmul.f32 %v562_v2, %v947_v1  ;;  %v378_v21 = vmul.f32 %v561_v59, %v952_v5 }
  0x75   : > { %v390_v22 = vmul.f32 %v562_v2, %v954_v6  ;;  %555 = vst [vmem:[%s993_s15 + $0xe0] sm:$0xff] %v357_v9  ;;  %556 = vst [vmem:[%s993_s15 + $0xe8] sm:$0xff] %v358_v13  ;;  %v360_v26 = vadd.f32 %v352_v14, %v340_v8  ;;  %v379_v27 = vmul.f32 %v561_v59, %v959_v10 }
  0x76   : > { %v391_v28 = vmul.f32 %v562_v2, %v961_v11  ;;  %v380_v0 = vmul.f32 %v561_v59, %v963_v12  ;;  %557 = vst [vmem:[%s993_s15 + $0xf0] sm:$0xff] %v359_v19  ;;  %v397_v29 = vadd.f32 %v389_v20, %v377_v16  ;;  %v392_v5 = vmul.f32 %v562_v2, %v967_v15 }
  0x77   : > { %v398_v1 = vadd.f32 %v390_v22, %v378_v21  ;;  %v381_v6 = vmul.f32 %v561_v59, %v970_v17  ;;  %558 = vst [vmem:[%s993_s15 + $0xf8] sm:$0xff] %v360_v26  ;;  %v393_v34 = vmul.f32 %v562_v2, %v972_v18  ;;  %v382_v10 = vmul.f32 %v561_v59, %v976_v23 }
  0x78   : > { %v399_v33 = vadd.f32 %v391_v28, %v379_v27  ;;  %v394_v11 = vmul.f32 %v562_v2, %v978_v24  ;;  %563 = vst [vmem:[%s993_s15 + $0x100] sm:$0xff] %v397_v29  ;;  %v400_v12 = vadd.f32 %v392_v5, %v380_v0  ;;  %v383_v15 = vmul.f32 %v561_v59, %v980_v25 }
  0x79   : > { %564 = vst [vmem:[%s993_s15 + $0x108] sm:$0xff] %v398_v1  ;;  %v395_v17 = vmul.f32 %v562_v2, %v985_v30  ;;  %v384_v35 = vmul.f32 %v561_v59, %v987_v31  ;;  %v401_v18 = vadd.f32 %v393_v34, %v381_v6  ;;  %v396_v24 = vmul.f32 %v562_v2, %v989_v32 }
  0x7a   : > { %565 = vst [vmem:[%s993_s15 + $0x110] sm:$0xff] %v399_v33  ;;  %v402_v23 = vadd.f32 %v394_v11, %v382_v10  ;;  %566 = vst [vmem:[%s993_s15 + $0x118] sm:$0xff] %v400_v12 }
  0x7b   : > { %v403_v36 = vadd.f32 %v395_v17, %v383_v15  ;;  %567 = vst [vmem:[%s993_s15 + $0x120] sm:$0xff] %v401_v18  ;;  %v404_v37 = vadd.f32 %v396_v24, %v384_v35 }
  0x7c   : > { %568 = vst [vmem:[%s993_s15 + $0x128] sm:$0xff] %v402_v23 }
  0x7d   : > { %569 = vst [vmem:[%s993_s15 + $0x130] sm:$0xff] %v403_v36  ;;  %570 = vst [vmem:[%s993_s15 + $0x138] sm:$0xff] %v404_v37 }
  0x7e   : > { %716 = shalt.err (!%p713_p7)
}
  0x7f   : > { %s717_s24 = scalar_lea.hbm %s1114_s28, 5120  ;;  %s721_s26 = scalar_lea.hbm %s1163_s2, 20480 }
  0x80   : > { %p718_p9 = scmp.ne.s32.totalorder %s1114_s28, %s717_s24  ;;  %p722_p5 = scmp.lt.u32.totalorder %s1114_s28, %s1163_s2 }
  0x81   : > { %p723_p2 = scmp.lt.u32.totalorder %s721_s26, %s717_s24  ;;  %p725_p1 = scmp.lt.u32.totalorder %s717_s24, %s1114_s28 }
  0x82   : > { %p719_p11 = pnand %p718_p9, %p882_p12 }
  0x83   : > { %p724_p10 = por %p723_p2, %p722_p5 }
  0x84   : > { %p720_p0 = pneg %p719_p11 }
  0x85   : > { %p726_p4 = por %p725_p1, %p724_p10 }
  0x87   : > { %p727_p6 = pnand %p726_p4, %p720_p0 }
  0x89   : > { %730 = shalt.err (!%p727_p6)
}
  0x8a   : > { %s782_s3 = smov 128   ;;  %s783_s17 = smov 8  }
  0x8b   : > { %588 = dma.vmem_to_hbm [thread:$0]  (%p882_p12), %s1116_s19, 5120, %s1114_s28, %s415_s4, %s782_s3, %s782_s3, %s783_s17  }
  0x8c PF: > { %p605_p8 = scmp.ge.s32.totalorder %s773_s12, 2  ;;  %s444_s15 = sand.u32 1, %s761_s9  }
  0x8d   : > { %p1178_p13 = scmp.ne.s32.totalorder %s1168_s16, 0  ;;  %s445_s27 = scalar_lea.sflag [#allocation4], %s444_s15 }
  0x8f   : > { %p599_p3 = pnand %p605_p8, %p1178_p13 }
  0x91   : > { %756 = dma.done.wait (!%p599_p3), %s445_s27, 5120  }
  0x92   : > { %758 = vsyncadd (!%p599_p3), %s445_s27, 4294962176  ;;  %p16_p7 = scmp.ge.s32.totalorder %s852_s21, 6   ;;  %s1179_s9 = smov %s765_s10 }
  0x93   : > { %s1180_s10 = smov %s769_s11  ;;  %s1181_s11 = smov %s878_s8 }
  0x94   : > { %s1182_s12 = smov %s852_s21  ;;  %18 = sbr.rel (!%p16_p7) target bundleno = 6 (0x6), region = 87 }
  0x9b   :  { %450 = vsyncpa [#allocation3], 1 }
  0x9c   :  { %452 = vsyncpa [#allocation3 + $0x1], 1 }
  0x9d   :  { %453 = vsyncpa [#allocation6], 1 }
  0x9e   :  { %455 = vsyncpa [#allocation6 + $0x1], 1 }
  0x9f   :  { %456 = vsyncpa [#allocation4], 1 }
  0xa0   :  { %458 = vsyncpa [#allocation4 + $0x1], 1 }

</bundles_post_ra>
